<compile_context>
chip_gen: v6e
topology: v6e:2x2x1
jax: 0.10.0
libtpu: 0.0.40
codegen_flags: <defaults>
</compile_context>

<pallas_src>
import jax
import jax.numpy as jnp
from jax import lax
from jax.experimental import pallas as pl
from jax.experimental.pallas import tpu as pltpu

EMBEDDING_SIZE = 50
HIDDEN = 128


def _round_up(x, m):
    return (x + m - 1) // m * m


def _choose_batch_tile(batch):
    # Cap at 256 (fills the MXU M dimension / lane-dense stores for big batches)
    # but never take more than ~half the batch per tile, so any batch > 8 yields
    # at least 2 grid tiles for v7x's 2-TensorCore "parallel" sharding.
    half = -(-max(batch, 1) // 2)               # ceil(batch / 2)
    return max(8, min(256, _round_up(half, 8)))


def _fused_kernel(uid_ref, mid_ref,            # (tb, 1) int32 id blocks (VMEM)
                  u_fold_ref, m_fold_ref,      # (NU,128)/(NM,128) bf16 folded tables
                  b1_ref, w2_ref,              # (1,128) f32 rows (VMEM, resident)
                  b2_ref,                      # (1,) f32 scalar (SMEM)
                  o_ref):                      # (1, 1, tb) f32 output block
    tb = uid_ref.shape[0]
    nu = u_fold_ref.shape[0]
    nm = m_fold_ref.shape[0]

    uids = uid_ref[...]                        # (tb, 1) int32
    mids = mid_ref[...]                        # (tb, 1) int32

    # Vectorized gather: one-hot row-selection matrices, consumed by the MXU.
    # (The one-hot entries are exactly 0.0 / 1.0 in bf16, so the selection is
    # exact; all approximation comes from the bf16 folded tables.)
    oh_u = (lax.broadcasted_iota(jnp.int32, (tb, nu), 1) == uids).astype(jnp.bfloat16)
    oh_m = (lax.broadcasted_iota(jnp.int32, (tb, nm), 1) == mids).astype(jnp.bfloat16)

    # Layer 1 (embedding lookup + Linear(100,128) folded together): two bf16
    # MXU matmuls with f32 accumulation, then bias + ReLU on the VPU in f32.
    h = jnp.dot(oh_u, u_fold_ref[...], preferred_element_type=jnp.float32)
    h = h + jnp.dot(oh_m, m_fold_ref[...], preferred_element_type=jnp.float32)
    h = jnp.maximum(h + b1_ref[...], 0.0)      # (tb, 128) f32

    # Layer 2 (128 -> 1), lane-dense: (1,128) . (tb,128)^T -> (1, tb).
    out = lax.dot_general(w2_ref[...], h, (((1,), (1,)), ((), ())),
                          preferred_element_type=jnp.float32)
    o_ref[...] = jnp.reshape(out + b2_ref[0], (1, 1, tb))


def recommender_forward(user_input, movie_input, kparams):
    """Fused forward pass.  user_input / movie_input: (B,) integer ids."""
    batch = user_input.shape[0]
    tb = _choose_batch_tile(batch)
    nb = pl.cdiv(batch, tb)
    b_pad = nb * tb

    uids = user_input.astype(jnp.int32)
    mids = movie_input.astype(jnp.int32)
    if b_pad != batch:
        # Pad with id 0 (a valid row); the padded outputs are sliced off below.
        uids = jnp.pad(uids, (0, b_pad - batch))
        mids = jnp.pad(mids, (0, b_pad - batch))
    uids = uids.reshape(b_pad, 1)
    mids = mids.reshape(b_pad, 1)

    u_fold = kparams["u_fold"]
    m_fold = kparams["m_fold"]
    nu_p, nm_p = u_fold.shape[0], m_fold.shape[0]

    resident = lambda shape: pl.BlockSpec(shape, lambda i: (0,) * len(shape))

    out = pl.pallas_call(
        _fused_kernel,
        out_shape=jax.ShapeDtypeStruct((nb, 1, tb), jnp.float32),
        grid=(nb,),
        in_specs=[
            pl.BlockSpec((tb, 1), lambda i: (i, 0)),       # uids tile
            pl.BlockSpec((tb, 1), lambda i: (i, 0)),       # mids tile
            resident((nu_p, HIDDEN)),                      # folded user table (bf16)
            resident((nm_p, HIDDEN)),                      # folded movie table (bf16)
            resident((1, HIDDEN)),                         # b1 (f32)
            resident((1, HIDDEN)),                         # w2 row (f32)
            pl.BlockSpec(memory_space=pltpu.MemorySpace.SMEM),   # b2 scalar
        ],
        out_specs=pl.BlockSpec((1, 1, tb), lambda i: (i, 0, 0)),
        compiler_params=pltpu.CompilerParams(
            dimension_semantics=("parallel",),   # batch tiles independent; v7x 2-TC shard
        ),
    )(uids, mids, u_fold, m_fold,
      kparams["b1"], kparams["w2_row"], kparams["b2"])

    return jnp.squeeze(out.reshape(b_pad)[:batch])         # matches torch .squeeze()


def init_params(key, num_users, num_movies, embedding_size=EMBEDDING_SIZE, hidden=HIDDEN):
    """f32 master params with the same shapes / init style as the PyTorch module."""
    k = jax.random.split(key, 6)
    in_dim = 2 * embedding_size
    lim1 = 1.0 / jnp.sqrt(in_dim)
    lim2 = 1.0 / jnp.sqrt(hidden)
    return {
        "user_embedding": jax.random.normal(k[0], (num_users, embedding_size), jnp.float32),
        "movie_embedding": jax.random.normal(k[1], (num_movies, embedding_size), jnp.float32),
        "w1": jax.random.uniform(k[2], (in_dim, hidden), jnp.float32, -lim1, lim1),
        "b1": jax.random.uniform(k[3], (hidden,), jnp.float32, -lim1, lim1),
        "w2": jax.random.uniform(k[4], (hidden, 1), jnp.float32, -lim2, lim2),
        "b2": jax.random.uniform(k[5], (1,), jnp.float32, -lim2, lim2),
    }


def prepare_kernel_params(params):
    """One-time layout prep (hoisted out of the per-call wrapper).

    * W1 is folded into the embedding tables (f32 matmul at prep time):
        U' = user_emb @ W1[:E],  M' = movie_emb @ W1[E:]   -> (n, 128) each.
    * Row counts padded to a multiple of 128 (zero rows) so the in-kernel
      one-hot matmul's K dimension is MXU-native; padded rows are never selected.
    * Folded tables stored bf16 (halves VMEM residency); b1 / w2 kept as
      (1, 128) f32 rows; b2 as a (1,) f32 SMEM scalar.
    """
    emb = params["user_embedding"].shape[1]
    hidden = params["b1"].shape[0]
    w1_u = params["w1"][:emb, :]
    w1_m = params["w1"][emb:, :]
    u_fold = params["user_embedding"].astype(jnp.float32) @ w1_u     # (nu, 128)
    m_fold = params["movie_embedding"].astype(jnp.float32) @ w1_m    # (nm, 128)
    nu_p = _round_up(u_fold.shape[0], 128)
    nm_p = _round_up(m_fold.shape[0], 128)
    u_fold = jnp.pad(u_fold, ((0, nu_p - u_fold.shape[0]), (0, 0)))
    m_fold = jnp.pad(m_fold, ((0, nm_p - m_fold.shape[0]), (0, 0)))
    return {
        "u_fold": u_fold.astype(jnp.bfloat16),
        "m_fold": m_fold.astype(jnp.bfloat16),
        "b1": params["b1"].reshape(1, hidden).astype(jnp.float32),
        "w2_row": params["w2"].reshape(1, hidden).astype(jnp.float32),
        "b2": params["b2"].reshape(1).astype(jnp.float32),
    }


if __name__ == "__main__":
    key = jax.random.PRNGKey(0)
    num_users, num_movies, batch = 64, 96, 20

    pkey, ukey, mkey = jax.random.split(key, 3)
    params = init_params(pkey, num_users, num_movies)
    kparams = prepare_kernel_params(params)

    user_input = jax.random.randint(ukey, (batch,), 0, num_users, dtype=jnp.int32)
    movie_input = jax.random.randint(mkey, (batch,), 0, num_movies, dtype=jnp.int32)

    fwd = jax.jit(recommender_forward)
    out = jax.block_until_ready(fwd(user_input, movie_input, kparams))

    # Pure-f32 reference matching the PyTorch module.  The kernel deviates only
    # by bf16 rounding of the W1-folded tables (one-hot selection is exact), so
    # a 1e-2 tolerance comfortably validates.
    u_emb = params["user_embedding"][user_input]
    m_emb = params["movie_embedding"][movie_input]
    x = jnp.concatenate([u_emb, m_emb], axis=-1)
    h = jnp.maximum(x @ params["w1"] + params["b1"], 0.0)
    ref = jnp.squeeze(h @ params["w2"] + params["b2"])

    assert out.shape == (batch,), out.shape
    assert jnp.allclose(out, ref, atol=1e-2, rtol=1e-2), float(jnp.max(jnp.abs(out - ref)))
    print("KERNEL_OK")
</pallas_src>

<mosaic_0001>
module attributes {stable_mosaic.version = 11 : i64} {
  func.func @_fused_kernel(%arg0: i32, %arg1: memref<16x1xi32, #tpu.memory_space<vmem>>, %arg2: memref<16x1xi32, #tpu.memory_space<vmem>>, %arg3: memref<128x128xbf16, #tpu.memory_space<vmem>>, %arg4: memref<128x128xbf16, #tpu.memory_space<vmem>>, %arg5: memref<1x128xf32, #tpu.memory_space<vmem>>, %arg6: memref<1x128xf32, #tpu.memory_space<vmem>>, %arg7: memref<1xf32, #tpu.memory_space<smem>>, %arg8: memref<1x1x16xf32, #tpu.memory_space<vmem>>) attributes {dimension_semantics = [#tpu.dimension_semantics<parallel>], iteration_bounds = array<i64: 2>, scalar_prefetch = 0 : i64, scratch_operands = 0 : i64, tpu.core_type = #tpu.core_type<tc>, window_params = [{transform_indices = @transform_0, window_bounds = array<i64: 16, 1>}, {transform_indices = @transform_1, window_bounds = array<i64: 16, 1>}, {pipeline_mode = #tpu.pipeline_mode<synchronous>, transform_indices = @transform_2, window_bounds = array<i64: 128, 128>}, {pipeline_mode = #tpu.pipeline_mode<synchronous>, transform_indices = @transform_3, window_bounds = array<i64: 128, 128>}, {pipeline_mode = #tpu.pipeline_mode<synchronous>, transform_indices = @transform_4, window_bounds = array<i64: 1, 128>}, {pipeline_mode = #tpu.pipeline_mode<synchronous>, transform_indices = @transform_5, window_bounds = array<i64: 1, 128>}, {transform_indices = @transform_6, window_bounds = array<i64: 1>}, {transform_indices = @transform_7, window_bounds = array<i64: 1, 1, 16>}]} {
    %c0 = arith.constant 0 : index
    %c0_0 = arith.constant 0 : index
    %0 = vector.load %arg1[%c0, %c0_0] : memref<16x1xi32, #tpu.memory_space<vmem>>, vector<16x1xi32>
    %c0_1 = arith.constant 0 : index
    %c0_2 = arith.constant 0 : index
    %1 = vector.load %arg2[%c0_1, %c0_2] : memref<16x1xi32, #tpu.memory_space<vmem>>, vector<16x1xi32>
    %2 = tpu.iota {dimensions = array<i32: 1>} : vector<16x128xi32>
    %3 = vector.broadcast %0 : vector<16x1xi32> to vector<16x128xi32>
    %4 = arith.cmpi eq, %2, %3 : vector<16x128xi32>
    %5 = arith.extui %4 : vector<16x128xi1> to vector<16x128xi32>
    %6 = arith.sitofp %5 : vector<16x128xi32> to vector<16x128xf32>
    %7 = arith.truncf %6 : vector<16x128xf32> to vector<16x128xbf16>
    %8 = tpu.iota {dimensions = array<i32: 1>} : vector<16x128xi32>
    %9 = vector.broadcast %1 : vector<16x1xi32> to vector<16x128xi32>
    %10 = arith.cmpi eq, %8, %9 : vector<16x128xi32>
    %11 = arith.extui %10 : vector<16x128xi1> to vector<16x128xi32>
    %12 = arith.sitofp %11 : vector<16x128xi32> to vector<16x128xf32>
    %13 = arith.truncf %12 : vector<16x128xf32> to vector<16x128xbf16>
    %c0_3 = arith.constant 0 : index
    %c0_4 = arith.constant 0 : index
    %14 = vector.load %arg3[%c0_3, %c0_4] : memref<128x128xbf16, #tpu.memory_space<vmem>>, vector<128x128xbf16>
    %cst = arith.constant dense<0.000000e+00> : vector<16x128xf32>
    %15 = tpu.matmul %7, %14, %cst {dimension_numbers = #tpu.dot_dimension_numbers<[1], [0], [0], [1], [0, 0, 1, 1], [], []>} : vector<16x128xbf16>, vector<128x128xbf16>, vector<16x128xf32> -> vector<16x128xf32>
    %c0_5 = arith.constant 0 : index
    %c0_6 = arith.constant 0 : index
    %16 = vector.load %arg4[%c0_5, %c0_6] : memref<128x128xbf16, #tpu.memory_space<vmem>>, vector<128x128xbf16>
    %cst_7 = arith.constant dense<0.000000e+00> : vector<16x128xf32>
    %17 = tpu.matmul %13, %16, %cst_7 {dimension_numbers = #tpu.dot_dimension_numbers<[1], [0], [0], [1], [0, 0, 1, 1], [], []>} : vector<16x128xbf16>, vector<128x128xbf16>, vector<16x128xf32> -> vector<16x128xf32>
    %18 = arith.addf %15, %17 : vector<16x128xf32>
    %c0_8 = arith.constant 0 : index
    %c0_9 = arith.constant 0 : index
    %19 = vector.load %arg5[%c0_8, %c0_9] : memref<1x128xf32, #tpu.memory_space<vmem>>, vector<1x128xf32>
    %20 = vector.broadcast %19 : vector<1x128xf32> to vector<16x128xf32>
    %21 = arith.addf %18, %20 : vector<16x128xf32>
    %cst_10 = arith.constant 0.000000e+00 : f32
    %22 = vector.broadcast %cst_10 : f32 to vector<16x128xf32>
    %23 = arith.maximumf %21, %22 : vector<16x128xf32>
    %c0_11 = arith.constant 0 : index
    %c0_12 = arith.constant 0 : index
    %24 = vector.load %arg6[%c0_11, %c0_12] : memref<1x128xf32, #tpu.memory_space<vmem>>, vector<1x128xf32>
    %cst_13 = arith.constant dense<0.000000e+00> : vector<1x16xf32>
    %25 = tpu.matmul %24, %23, %cst_13 {dimension_numbers = #tpu.dot_dimension_numbers<[1], [1], [0], [0], [0, 0, 1, 0], [], []>} : vector<1x128xf32>, vector<16x128xf32>, vector<1x16xf32> -> vector<1x16xf32>
    %c0_14 = arith.constant 0 : index
    %26 = memref.load %arg7[%c0_14] : memref<1xf32, #tpu.memory_space<smem>>
    %27 = vector.broadcast %26 : f32 to vector<1x16xf32>
    %28 = arith.addf %25, %27 : vector<1x16xf32>
    %29 = vector.shape_cast %28 : vector<1x16xf32> to vector<1x1x16xf32>
    %c0_15 = arith.constant 0 : index
    %c0_16 = arith.constant 0 : index
    %c0_17 = arith.constant 0 : index
    %30 = vector.load %arg8[%c0_15, %c0_16, %c0_17] : memref<1x1x16xf32, #tpu.memory_space<vmem>>, vector<1x1x16xf32>
    tpu.vector_store %arg8[%c0_15, %c0_16, %c0_17], %29 {strides = array<i32>} : memref<1x1x16xf32, #tpu.memory_space<vmem>>, vector<1x1x16xf32>,
    return
  }
  func.func @transform_0(%arg0: i32) -> (i32, i32) {
    %c0_i32 = arith.constant 0 : i32
    %c0_i32_0 = arith.constant 0 : i32
    return %arg0, %c0_i32 : i32, i32
  }
  func.func @transform_1(%arg0: i32) -> (i32, i32) {
    %c0_i32 = arith.constant 0 : i32
    %c0_i32_0 = arith.constant 0 : i32
    return %arg0, %c0_i32 : i32, i32
  }
  func.func @transform_2(%arg0: i32) -> (i32, i32) {
    %c0_i32 = arith.constant 0 : i32
    %c0_i32_0 = arith.constant 0 : i32
    %c0_i32_1 = arith.constant 0 : i32
    return %c0_i32, %c0_i32_0 : i32, i32
  }
  func.func @transform_3(%arg0: i32) -> (i32, i32) {
    %c0_i32 = arith.constant 0 : i32
    %c0_i32_0 = arith.constant 0 : i32
    %c0_i32_1 = arith.constant 0 : i32
    return %c0_i32, %c0_i32_0 : i32, i32
  }
  func.func @transform_4(%arg0: i32) -> (i32, i32) {
    %c0_i32 = arith.constant 0 : i32
    %c0_i32_0 = arith.constant 0 : i32
    %c0_i32_1 = arith.constant 0 : i32
    return %c0_i32, %c0_i32_0 : i32, i32
  }
  func.func @transform_5(%arg0: i32) -> (i32, i32) {
    %c0_i32 = arith.constant 0 : i32
    %c0_i32_0 = arith.constant 0 : i32
    %c0_i32_1 = arith.constant 0 : i32
    return %c0_i32, %c0_i32_0 : i32, i32
  }
  func.func @transform_6(%arg0: i32) -> i32 {
    %c0_i32 = arith.constant 0 : i32
    %c0_i32_0 = arith.constant 0 : i32
    return %c0_i32 : i32
  }
  func.func @transform_7(%arg0: i32) -> (i32, i32, i32) {
    %c0_i32 = arith.constant 0 : i32
    %c0_i32_0 = arith.constant 0 : i32
    %c0_i32_1 = arith.constant 0 : i32
    return %arg0, %c0_i32, %c0_i32_0 : i32, i32, i32
  }
}

</mosaic_0001>

<bundles_post_ra>
// kernel: recommender_forward.1
= control target key start
LH: loop header
LB: loop body
LE: loop exit
PB: predicated region body
PF: predicated region fallthrough
CT: control target
= control target key end

     0   :  { %s1049_s0 = inlined_call_operand.vmem [shape: s32[32,1], index: 0, kind: input, shape index: {}]   ;;  %s1050_s1 = inlined_call_operand.vmem [shape: s32[32,1], index: 1, kind: input, shape index: {}]   ;;  %s1051_s2 = inlined_call_operand.vmem [shape: bf16[128,128], index: 2, kind: input, shape index: {}]   ;;  %s1052_s3 = inlined_call_operand.hbm [shape: bf16[128,128], index: 3, kind: input, shape index: {}]   ;;  %s1053_s4 = inlined_call_operand.vmem [shape: f32[1,128], index: 4, kind: input, shape index: {}]   ;;  %s1054_s5 = inlined_call_operand.vmem [shape: f32[1,128], index: 5, kind: input, shape index: {}]   ;;  %s1055_s6 = inlined_call_operand.<no memory space> [shape: f32[1], index: 6, kind: input, shape index: {}]   ;;  %s1056_s7 = inlined_call_operand.vmem [shape: f32[2,1,16], index: 7, kind: output, shape index: {}]  }
   0x1   :  { %12 = sst [smem:[#allocation2]] %s1055_s6 }
   0x2   :  { %13 = vsyncpa [#allocation4], 0  ;;  %s952_s26 = smov 0  }
   0x3 LB: > { %s958_s27 = sadd.s32 4294967295, %s900_s26   ;;  %p717_p0 = scmp.ge.s32.totalorder %s900_s26, 1  ;;  %s900_s26 = sphi %s952_s26, %s19_s26  }
   0x4   : > { %p207_p1 = scmp.lt.s32.totalorder %s900_s26, 3  ;;  %s902_s28 = smov [#allocation3]  }
   0x5   : > { %s222_s29 = sshll.u32 %s902_s28, 4  ;;  %p829_p3 = scmp.eq.s32.totalorder %s958_s27, 0  ;;  %s223_s29 = int_to_ptr.vmem [resolvable:$true] %s222_s29 }
   0x6   : > { %p962_p2 = pnand %p717_p0, %p207_p1  ;;  %s875_s30 = scalar_lea.vmem %s223_s29, 1024 }
   0x7   : > { %p876_p7 = scmp.ne.s32.totalorder %s223_s29, %s875_s30  ;;  %p883_p10 = scmp.lt.s32.totalorder %s223_s29, %s223_s29 }
   0x8   : > { %p825_p4 = pneg %p962_p2  ;;  %p884_p11 = scmp.lt.s32.totalorder %s875_s30, %s875_s30 }
   0xa   : > { %p826_p5 = pnand %p829_p3, %p825_p4  ;;  %p885_p12 = por %p884_p11, %p883_p10 }
   0xc   : > { %p866_p6 = pneg %p826_p5 }
   0xe   : > { %p878_p8 = pnand %p876_p7, %p866_p6 }
  0x10   : > { %p879_p9 = pneg %p878_p8 }
  0x12   : > { %p886_p13 = pnand %p885_p12, %p879_p9 }
  0x14   : > { %889 = shalt.err (!%p886_p13)
}
  0x15   : > { %s903_s8 = smov 64   ;;  %s904_s9 = smov 4  }
  0x16   : > { %828 = dma.hbm_to_vmem [thread:$0]  (!%p826_p5), %s1052_s3, 1024, %s223_s29, [#allocation4], %s903_s8, %s903_s8, %s904_s9  }
  0x17   : > { %265 = sbr.rel (%p962_p2) target bundleno = 573 (0x23d), region = 48 }
  0x1c   : > { %895 = dma.done.wait (%p829_p3), [#allocation4], 1024  }
  0x1d   : > { %897 = vsyncadd (%p829_p3), [#allocation4], 4294966272  ;;  %s722_s12 = sshll.u32 %s958_s27, 1  ;;  %v905_v0 = vmov 0   ;;  %v906_v1 = vmov 0.0   ;;  %v848_v6 = vld [vmem:[#allocation3 + $0x38] sm:$0xff]   ;;  %v320_v22 = vlaneseq }
  0x1e   : > { %847 = vset.pattern.permute.xlu1 %v905_v0  ;;  %846 = vset.pattern.permute.xlu0 %v905_v0  ;;  %p301_p0 = scmp.lt.s32.totalorder %s722_s12, 3  ;;  %v849_v7 = vld [vmem:[%s1051_s2 + $0x38] sm:$0xff]   ;;  %vm907_vm0 = vmmov 0   ;;  %v850_v8 = vld [vmem:[#allocation3 + $0x30] sm:$0xff]   ;;  %v852_v10 = vld [vmem:[#allocation3 + $0x28] sm:$0xff]   ;;  %s570_s18 = sld [smem:[#allocation2]] }
  0x1f   : > { %774 = vmatprep.subr.bf16.mxu0 %v906_v1  ;;  %794 = vmatprep.subr.bf16.mxu1 %v906_v1  ;;  %v851_v9 = vld [vmem:[%s1051_s2 + $0x30] sm:$0xff]   ;;  %v853_v11 = vld [vmem:[%s1051_s2 + $0x28] sm:$0xff]   ;;  %v854_v12 = vld [vmem:[#allocation3 + $0x20] sm:$0xff]   ;;  %v321_v25 = vand.u32 127, %v320_v22  ;;  %v908_v28 = vmov 1.0|1.0  }
  0x20   : > { %s1059_s12 = smov (!%p301_p0, %s722_s12), 3  ;;  %790 = vmatprep.mubr.msk.bf16.mxu0 %vm907_vm0, %v906_v1  ;;  %810 = vmatprep.mubr.msk.bf16.mxu1 %vm907_vm0, %v906_v1  ;;  %v855_v13 = vld [vmem:[%s1051_s2 + $0x20] sm:$0xff]   ;;  %v856_v14 = vld [vmem:[#allocation3 + $0x18] sm:$0xff]   ;;  %v858_v16 = vld [vmem:[#allocation3 + $0x10] sm:$0xff]   ;;  %p312_p1 = scmp.lt.s32.totalorder %s958_s27, 1  ;;  %vm642_vm7 = vcmask 122880  }
  0x21   : > { %s723_s13 = sshll.u32 %s1059_s12, 3  ;;  %775 = vmatpush3.bf16.msra.mxu0 %v848_v6  ;;  %795 = vmatpush3.bf16.msra.mxu1 %v849_v7  ;;  %v857_v15 = vld [vmem:[%s1051_s2 + $0x18] sm:$0xff]   ;;  %v859_v17 = vld [vmem:[%s1051_s2 + $0x10] sm:$0xff]   ;;  %v860_v18 = vld [vmem:[#allocation3 + $0x8] sm:$0xff]  }
  0x22   : > { %s310_s16 = scalar_lea.vmem %s1050_s1, %s723_s13  ;;  %s304_s19 = scalar_lea.vmem %s1049_s0, %s723_s13  ;;  %776 = vmatprep.subr.bf16.mxu0 %v906_v1  ;;  %796 = vmatprep.subr.bf16.mxu1 %v906_v1  ;;  %v861_v19 = vld [vmem:[%s1051_s2 + $0x8] sm:$0xff]   ;;  %v862_v20 = vld [vmem:[#allocation3] sm:$0xff]  }
  0x23   : > { %v318_v2 = vld [vmem:[%s310_s16] sm:$0xff]  ;;  %v319_v4 = vld [vmem:[%s310_s16 + $0x8] sm:$0xff]  ;;  %s1061_s27 = smov (!%p312_p1, %s958_s27), 1 }
  0x24   : > { %v316_v3 = vld [vmem:[%s304_s19] sm:$0xff]  ;;  %336 = vperm.xlu1 %847, %v318_v2   ;;  %v317_v5 = vld [vmem:[%s304_s19 + $0x8] sm:$0xff]  ;;  %v571_v45 = vstv %s570_s18  ;;  %s314_s21 = scalar_lea.vmem %s1056_s7, %s1061_s27 }
  0x25   : > { %323 = vperm.xlu0 %846, %v316_v3   ;;  %777 = vmatpush3.bf16.msra.mxu0 %v850_v8  ;;  %v863_v21 = vld [vmem:[%s1051_s2] sm:$0xff]  }
  0x26   : > { %778 = vmatprep.subr.bf16.mxu0 %v906_v1  ;;  %797 = vmatpush3.bf16.msra.mxu1 %v851_v9  ;;  %v750_v38 = vld [vmem:[%s1053_s4] ss:$0 sm:$0xff] }
  0x27   : > { %798 = vmatprep.subr.bf16.mxu1 %v906_v1  ;;  %v569_v44 = vld [vmem:[%s1054_s5] sm:$0x1] }
  0x28   : > { %339 = vperm.xlu1 %847, %v319_v4  }
  0x29   : > { %326 = vperm.xlu0 %846, %v317_v5   ;;  %779 = vmatpush3.bf16.msra.mxu0 %v852_v10 }
  0x2a   : > { %780 = vmatprep.subr.bf16.mxu0 %v906_v1  ;;  %799 = vmatpush3.bf16.msra.mxu1 %v853_v11 }
  0x2b   : > { %800 = vmatprep.subr.bf16.mxu1 %v906_v1 }
  0x2d   : > { %781 = vmatpush3.bf16.msra.mxu0 %v854_v12 }
  0x2e   : > { %782 = vmatprep.subr.bf16.mxu0 %v906_v1  ;;  %801 = vmatpush3.bf16.msra.mxu1 %v855_v13 }
  0x2f   : > { %802 = vmatprep.subr.bf16.mxu1 %v906_v1 }
  0x31   : > { %783 = vmatpush3.bf16.msra.mxu0 %v856_v14 }
  0x32   : > { %784 = vmatprep.subr.bf16.mxu0 %v906_v1  ;;  %803 = vmatpush3.bf16.msra.mxu1 %v857_v15 }
  0x33   : > { %804 = vmatprep.subr.bf16.mxu1 %v906_v1 }
  0x35   : > { %785 = vmatpush3.bf16.msra.mxu0 %v858_v16 }
  0x36   : > { %786 = vmatprep.subr.bf16.mxu0 %v906_v1  ;;  %805 = vmatpush3.bf16.msra.mxu1 %v859_v17 }
  0x37   : > { %806 = vmatprep.subr.bf16.mxu1 %v906_v1 }
  0x39   : > { %787 = vmatpush3.bf16.msra.mxu0 %v860_v18 }
  0x3a   : > { %788 = vmatprep.subr.bf16.mxu0 %v906_v1  ;;  %807 = vmatpush3.bf16.msra.mxu1 %v861_v19 }
  0x3b   : > { %808 = vmatprep.subr.bf16.mxu1 %v906_v1 }
  0x3d   : > { %789 = vmatpush3.bf16.msra.mxu0 %v862_v20 }
  0x3e   : > { %814 = vmatprep.subr.mxu0 %v906_v1  ;;  %809 = vmatpush3.bf16.msra.mxu1 %v863_v21 }
  0x9f   : > { %v337_v23 = vpop.permute.xlu1 %336 }
  0xa0   : > { %v324_v24 = vpop.permute.xlu0 %323  ;;  %vm341_vm1 = vcmp.eq.s32.totalorder %v321_v25, %v337_v23 }
  0xa1   : > { %vm328_vm4 = vcmp.eq.s32.totalorder %v321_v25, %v324_v24 }
  0xa3   : > { %v340_v26 = vpop.permute.xlu1 %339 }
  0xa4   : > { %v327_v27 = vpop.permute.xlu0 %326  ;;  %vm342_vm2 = vcmp.eq.s32.totalorder %v321_v25, %v340_v26 }
  0xa5   : > { %vm329_vm3 = vcmp.eq.s32.totalorder %v321_v25, %v327_v27  ;;  %vm738_vm5 = vmpackc.low %vm342_vm2, %vm341_vm1 }
  0xa6   : > { %vm748_vm6 = vmpackc.low %vm329_vm3, %vm328_vm4  ;;  %791 = vmatmul.mubr.msk.bf16.vlgmr.msra.gmra.mxu0 %vm738_vm5, %v908_v28 }
  0xa7   : > { %811 = vmatmul.mubr.msk.bf16.vlgmr.msra.gmra.mxu1 %vm748_vm6, %v908_v28  ;;  %818 = vmatprep.mubr.msk.f32.mxu0 %vm907_vm0, %v906_v1 }
 0x166   : > { %v462_v29 = vpop.f32.mrf.mxu0 }
 0x167   : > { %v551_v30 = vpop.f32.mrf.mxu1 }
 0x168   : > { %v792_v31 = vpop.f32.mrf.mxu0  ;;  %v552_v35 = vadd.f32 %v551_v30, %v462_v29 }
 0x169   : > { %v812_v32 = vpop.f32.mrf.mxu1 }
 0x16a   : > { %v465_v33 = vpop.f32.mrf.mxu0  ;;  %v565_v41 = vadd.f32 %v750_v38, %v552_v35 }
 0x16b   : > { %v554_v34 = vpop.f32.mrf.mxu1 }
 0x16c   : > { %v555_v36 = vadd.f32 %v554_v34, %v465_v33  ;;  %v793_v37 = vpop.f32.mrf.mxu0  ;;  %v567_v43 = vmax.f32 %v565_v41, 0.0 }
 0x16d   : > { %v813_v39 = vpop.f32.mrf.mxu1 }
 0x16e   : > { %v566_v40 = vadd.f32 %v750_v38, %v555_v36 }
 0x170   : > { %v568_v42 = vmax.f32 %v566_v40, 0.0 }
 0x172   : > { %815 = vmatpush3.xpose.msra.mxu0 %v568_v42 }
 0x173   : > { %816 = vmatprep.subr.mxu0 %v906_v1 }
 0x176   : > { %817 = vmatpush3.xpose.msra.mxu0 %v567_v43 }
 0x179   : > { %819 = vmatmul.mubr.f32.vlgmr.msra.gmra.mxu0 %v569_v44 }
 0x239   : > { %v638_v46 = vpop.f32.mrf.mxu0 }
 0x23a   : > { %v639_v47 = vadd.f32 %v638_v46, %v571_v45 }
 0x23b   : > { %v820_v48 = vpop.f32.mrf.mxu0 }
 0x23c   : > { %643 = vst.msk [vmem:[%s314_s21] sm:$0x1] %vm642_vm7, %v639_v47 }
 0x23d PF: > { %s19_s26 = sadd.s32 1, %s900_s26  }
 0x23e   : > { %p16_p2 = scmp.ge.s32.totalorder %s19_s26, 4  }
 0x240   :  { %18 = sbr.rel (!%p16_p2) target bundleno = 3 (0x3), region = 86 }
 0x245   :  { %661 = vsyncpa [#allocation4], 1 }
 0x246   :  { %663 = vsyncpa [#allocation4 + $0x1], 1 }

</bundles_post_ra>
